<compile_context>
chip_gen: v5e
topology: v5e:2x2
jax: 0.10.0
libtpu: 0.0.40
codegen_flags: <defaults>
</compile_context>

<pallas_src>
import jax
import jax.numpy as jnp
from jax.experimental import pallas as pl
from jax.experimental.pallas import tpu as pltpu

LANE = 128      # vreg lane width: pad hidden/output feature dims to multiples of this
SUBLANE = 8     # sublane granularity for the batch (row) dimension


def _round_up(x, m):
    return ((x + m - 1) // m) * m


# ----------------------------------------------------------------------------
# Kernel: 3 matmuls + 2 ReLUs.  BN/dropout already folded away in the wrapper.
# ----------------------------------------------------------------------------
def dnn_kernel(x_ref, w1_ref, b1_ref, w2_ref, b2_ref, w3_ref, b3_ref, o_ref):
    # x arrives unpadded in f32; cast to the matmul compute dtype in-kernel.
    x = x_ref[...].astype(w1_ref.dtype)
    # Block 1: (BN1 folded into w1/b1) -> dense1 -> ReLU   [dropout1: identity]
    h = jnp.dot(x, w1_ref[...], preferred_element_type=jnp.float32)
    h = jnp.maximum(h + b1_ref[...], 0.0).astype(w2_ref.dtype)
    # Block 2: (BN2 folded into w2/b2) -> dense2 -> ReLU   [dropout2: identity]
    h = jnp.dot(h, w2_ref[...], preferred_element_type=jnp.float32)
    h = jnp.maximum(h + b2_ref[...], 0.0).astype(w3_ref.dtype)
    # Block 3: (BN3 folded into w3/b3) -> dense3 (no activation)
    h = jnp.dot(h, w3_ref[...], preferred_element_type=jnp.float32) + b3_ref[...]
    o_ref[...] = h.astype(o_ref.dtype)   # bf16 writeback, f32 accumulation kept above


# ----------------------------------------------------------------------------
# Parameter folding / padding (plain-JAX glue, runs once)
# ----------------------------------------------------------------------------
def weight_norm(v, g, eps=1e-12):
    # PyTorch nn.utils.weight_norm on Linear (dim=0): w[o,i] = g[o]*v[o,i]/||v[o,:]||
    norm = jnp.sqrt(jnp.sum(v * v, axis=1, keepdims=True) + eps)
    return g[:, None] * v / norm


def bn_affine(gamma, beta, mean, var, eps=1e-5):
    scale = gamma / jnp.sqrt(var + eps)
    shift = beta - mean * scale
    return scale, shift


def fold_and_pad_params(params, compute_dtype=jnp.bfloat16):
    """Fold eval-mode BN into the weight-normed Linear weights.  Hidden/output
    feature dims are padded to lane multiples (128); w1's input dim is kept
    unpadded so the unpadded f32 x can be fed straight into the kernel."""
    bn1, lin1, bn2, lin2, bn3, lin3 = params

    def fold(bn, lin):
        gamma, beta, mean, var = bn
        v, g, b = lin
        w = weight_norm(v, g).T                 # (in, out)
        scale, shift = bn_affine(gamma, beta, mean, var)
        w_f = scale[:, None] * w                # (x*s + t) @ W == x @ (s*W) + t@W
        b_f = shift @ w + b
        return w_f, b_f

    w1, b1 = fold(bn1, lin1)   # (F, H)
    w2, b2 = fold(bn2, lin2)   # (H, H)
    w3, b3 = fold(bn3, lin3)   # (H, T)

    def pad_w(w, pad_in, pad_out):
        i, o = w.shape
        ip = _round_up(i, LANE) if pad_in else i
        op = _round_up(o, LANE) if pad_out else o
        return jnp.pad(w, ((0, ip - i), (0, op - o))).astype(compute_dtype)

    def pad_b(b):
        o = b.shape[0]
        op = _round_up(o, LANE)
        return jnp.pad(b, (0, op - o)).reshape(1, op).astype(jnp.float32)

    return (pad_w(w1, False, True), pad_b(b1),   # keep in-dim = num_features
            pad_w(w2, True, True), pad_b(b2),
            pad_w(w3, True, True), pad_b(b3))


# ----------------------------------------------------------------------------
# Tiling policy
# ----------------------------------------------------------------------------
def _choose_tiling(batch, tile_cap=1024):
    """Pick a batch tile (multiple of 8) that keeps row-padding waste <~6%,
    is as large as reasonable (per-grid-step overhead ~0.35 us), and yields
    >= 2 grid tiles when there is enough work (v7x megacore split)."""
    b8 = _round_up(batch, SUBLANE)
    if b8 >= 2 * SUBLANE:
        max_tile = min(tile_cap, _round_up((b8 + 1) // 2, SUBLANE))
    else:
        max_tile = b8
    tile = SUBLANE
    while tile * 2 <= max_tile:
        tile *= 2
    while tile > SUBLANE and (_round_up(b8, tile) - b8) > max(SUBLANE, b8 // 16):
        tile //= 2
    return tile, _round_up(b8, tile)


# ----------------------------------------------------------------------------
# Wrapper: batch-tiled pallas_call with VMEM-resident weights
# ----------------------------------------------------------------------------
def dnn_forward(x, folded, num_targets, *, tile_cap=1024, out_dtype=jnp.bfloat16,
                slice_output=True):
    w1, b1, w2, b2, w3, b3 = folded
    batch, feat = x.shape
    assert w1.shape[0] == feat, "folded w1 in-dim must equal num_features"
    t_pad = w3.shape[1]

    tile_m, batch_pad = _choose_tiling(batch, tile_cap)
    if batch_pad != batch:
        # Row-only zero-padding (no feature pad, no dtype cast): cheap and exact.
        x = jnp.pad(x, ((0, batch_pad - batch), (0, 0)))

    act_map = lambda i: (i, 0)        # per-grid-step activation tile
    resident_map = lambda i: (0, 0)   # same block every step -> stays in VMEM

    # VMEM guard: resident weights + double-buffered x/out tiles.
    # TODO(synk): if hidden grows so large that bf16 weights alone exceed ~64 MiB
    # (v7x per-TC VMEM), switch to a K/N-tiled grid with an f32 accumulator
    # instead of keeping all weights resident.
    weight_bytes = sum(int(a.size) * a.dtype.itemsize for a in (w1, b1, w2, b2, w3, b3))
    act_bytes = 2 * tile_m * (feat * x.dtype.itemsize
                              + t_pad * jnp.dtype(out_dtype).itemsize)
    vmem_needed = weight_bytes + act_bytes
    vmem_limit = None
    if vmem_needed > (14 << 20):                       # above smallest default scoped limit
        vmem_limit = min(vmem_needed + (4 << 20), 64 << 20)  # cap at v7x per-TC VMEM

    out = pl.pallas_call(
        dnn_kernel,
        out_shape=jax.ShapeDtypeStruct((batch_pad, t_pad), out_dtype),
        grid=(batch_pad // tile_m,),
        in_specs=[
            pl.BlockSpec((tile_m, feat), act_map),   # feat == full last dim -> legal, unpadded
            pl.BlockSpec(w1.shape, resident_map),
            pl.BlockSpec(b1.shape, resident_map),
            pl.BlockSpec(w2.shape, resident_map),
            pl.BlockSpec(b2.shape, resident_map),
            pl.BlockSpec(w3.shape, resident_map),
            pl.BlockSpec(b3.shape, resident_map),
        ],
        out_specs=pl.BlockSpec((tile_m, t_pad), act_map),
        compiler_params=pltpu.CompilerParams(
            dimension_semantics=("parallel",),   # shard batch tiles across TCs (v7x)
            vmem_limit_bytes=vmem_limit,
        ),
    )(x, w1, b1, w2, b2, w3, b3)

    if slice_output:
        return out[:batch, :num_targets]
    return out  # padded bf16 slab; caller masks/ignores padded rows & lanes


# ----------------------------------------------------------------------------
# References
# ----------------------------------------------------------------------------
def dnn_reference(x, params):
    """Unfused f32 eval-mode reference matching the PyTorch module."""
    bn1, lin1, bn2, lin2, bn3, lin3 = params

    def bn_apply(h, bn):
        gamma, beta, mean, var = bn
        return (h - mean) / jnp.sqrt(var + 1e-5) * gamma + beta

    def lin_apply(h, lin):
        v, g, b = lin
        return h @ weight_norm(v, g).T + b

    h = bn_apply(x, bn1)                              # dropout1: identity (eval)
    h = jnp.maximum(lin_apply(h, lin1), 0.0)
    h = bn_apply(h, bn2)                              # dropout2: identity
    h = jnp.maximum(lin_apply(h, lin2), 0.0)
    h = bn_apply(h, bn3)                              # dropout3: identity
    return lin_apply(h, lin3)


def dnn_reference_folded(x, folded, num_targets, out_dtype=jnp.bfloat16):
    """Plain-JAX version of exactly what the kernel computes (same folded
    bf16 operands, bf16 output) — validates the Pallas lowering tightly."""
    w1, b1, w2, b2, w3, b3 = folded
    h = jnp.dot(x.astype(w1.dtype), w1, preferred_element_type=jnp.float32) + b1
    h = jnp.maximum(h, 0.0).astype(w2.dtype)
    h = jnp.dot(h, w2, preferred_element_type=jnp.float32) + b2
    h = jnp.maximum(h, 0.0).astype(w3.dtype)
    h = jnp.dot(h, w3, preferred_element_type=jnp.float32) + b3
    return h.astype(out_dtype)[:, :num_targets]


# ----------------------------------------------------------------------------
# Deterministic parameter construction (PyTorch-like raw params)
# ----------------------------------------------------------------------------
def make_params(key, num_features, num_targets, hidden_size):
    ks = iter(jax.random.split(key, 24))
    f32 = jnp.float32

    def bn(n):
        gamma = 1.0 + 0.1 * jax.random.normal(next(ks), (n,), f32)
        beta = 0.1 * jax.random.normal(next(ks), (n,), f32)
        mean = 0.1 * jax.random.normal(next(ks), (n,), f32)
        var = 1.0 + 0.5 * jax.random.uniform(next(ks), (n,), f32)
        return (gamma, beta, mean, var)

    def lin(fan_in, fan_out):
        v = jax.random.normal(next(ks), (fan_out, fan_in), f32) * 0.1
        g = jnp.sqrt(jnp.sum(v * v, axis=1) + 1e-12) * (
            1.0 + 0.1 * jax.random.normal(next(ks), (fan_out,), f32))
        b = jax.random.normal(next(ks), (fan_out,), f32) * 0.05
        return (v, g, b)

    return (bn(num_features), lin(num_features, hidden_size),
            bn(hidden_size), lin(hidden_size, hidden_size),
            bn(hidden_size), lin(hidden_size, num_targets))


if __name__ == "__main__":
    # TODO(synk): training-mode BatchNorm (batch statistics + running-stat update)
    # and stochastic Dropout are not implemented; this is the eval-mode forward.
    num_features, num_targets, hidden_size = 32, 16, 64
    batch = 8

    key = jax.random.PRNGKey(0)
    kx, kp = jax.random.split(key)
    x = jax.random.normal(kx, (batch, num_features), jnp.float32)
    params = make_params(kp, num_features, num_targets, hidden_size)

    folded = fold_and_pad_params(params)
    out = jax.block_until_ready(dnn_forward(x, folded, num_targets))

    assert out.shape == (batch, num_targets)
    out_f32 = out.astype(jnp.float32)

    # Tight check vs identical folded/padded bf16 math (validates the kernel itself).
    ref_exact = dnn_reference_folded(x, folded, num_targets).astype(jnp.float32)
    assert jnp.allclose(out_f32, ref_exact, atol=5e-3, rtol=5e-3), \
        "mismatch vs folded reference"

    # Loose check vs the unfused f32 eval-mode module (bf16 operand/output rounding).
    ref_f32 = dnn_reference(x, params)
    assert jnp.allclose(out_f32, ref_f32, atol=2e-2, rtol=3e-2), \
        "mismatch vs f32 reference"

    print("KERNEL_OK")
</pallas_src>

<mosaic_0001>
module attributes {stable_mosaic.version = 11 : i64} {
  func.func @dnn_kernel(%arg0: i32, %arg1: memref<8x32xf32, #tpu.memory_space<vmem>>, %arg2: memref<32x128xbf16, #tpu.memory_space<vmem>>, %arg3: memref<1x128xf32, #tpu.memory_space<vmem>>, %arg4: memref<128x128xbf16, #tpu.memory_space<vmem>>, %arg5: memref<1x128xf32, #tpu.memory_space<vmem>>, %arg6: memref<128x128xbf16, #tpu.memory_space<vmem>>, %arg7: memref<1x128xf32, #tpu.memory_space<vmem>>, %arg8: memref<8x128xbf16, #tpu.memory_space<vmem>>) attributes {dimension_semantics = [#tpu.dimension_semantics<parallel>], iteration_bounds = array<i64: 1>, scalar_prefetch = 0 : i64, scratch_operands = 0 : i64, tpu.core_type = #tpu.core_type<tc>, window_params = [{transform_indices = @transform_0, window_bounds = array<i64: 8, 32>}, {pipeline_mode = #tpu.pipeline_mode<synchronous>, transform_indices = @transform_1, window_bounds = array<i64: 32, 128>}, {pipeline_mode = #tpu.pipeline_mode<synchronous>, transform_indices = @transform_2, window_bounds = array<i64: 1, 128>}, {pipeline_mode = #tpu.pipeline_mode<synchronous>, transform_indices = @transform_3, window_bounds = array<i64: 128, 128>}, {pipeline_mode = #tpu.pipeline_mode<synchronous>, transform_indices = @transform_4, window_bounds = array<i64: 1, 128>}, {pipeline_mode = #tpu.pipeline_mode<synchronous>, transform_indices = @transform_5, window_bounds = array<i64: 128, 128>}, {pipeline_mode = #tpu.pipeline_mode<synchronous>, transform_indices = @transform_6, window_bounds = array<i64: 1, 128>}, {transform_indices = @transform_7, window_bounds = array<i64: 8, 128>}]} {
    %c0 = arith.constant 0 : index
    %c0_0 = arith.constant 0 : index
    %0 = vector.load %arg1[%c0, %c0_0] : memref<8x32xf32, #tpu.memory_space<vmem>>, vector<8x32xf32>
    %1 = arith.truncf %0 : vector<8x32xf32> to vector<8x32xbf16>
    %c0_1 = arith.constant 0 : index
    %c0_2 = arith.constant 0 : index
    %2 = vector.load %arg2[%c0_1, %c0_2] : memref<32x128xbf16, #tpu.memory_space<vmem>>, vector<32x128xbf16>
    %cst = arith.constant dense<0.000000e+00> : vector<8x128xf32>
    %3 = tpu.matmul %1, %2, %cst {dimension_numbers = #tpu.dot_dimension_numbers<[1], [0], [0], [1], [0, 0, 1, 1], [], []>} : vector<8x32xbf16>, vector<32x128xbf16>, vector<8x128xf32> -> vector<8x128xf32>
    %c0_3 = arith.constant 0 : index
    %c0_4 = arith.constant 0 : index
    %4 = vector.load %arg3[%c0_3, %c0_4] : memref<1x128xf32, #tpu.memory_space<vmem>>, vector<1x128xf32>
    %5 = vector.broadcast %4 : vector<1x128xf32> to vector<8x128xf32>
    %6 = arith.addf %3, %5 : vector<8x128xf32>
    %cst_5 = arith.constant 0.000000e+00 : f32
    %7 = vector.broadcast %cst_5 : f32 to vector<8x128xf32>
    %8 = arith.maximumf %6, %7 : vector<8x128xf32>
    %9 = arith.truncf %8 : vector<8x128xf32> to vector<8x128xbf16>
    %c0_6 = arith.constant 0 : index
    %c0_7 = arith.constant 0 : index
    %10 = vector.load %arg4[%c0_6, %c0_7] : memref<128x128xbf16, #tpu.memory_space<vmem>>, vector<128x128xbf16>
    %cst_8 = arith.constant dense<0.000000e+00> : vector<8x128xf32>
    %11 = tpu.matmul %9, %10, %cst_8 {dimension_numbers = #tpu.dot_dimension_numbers<[1], [0], [0], [1], [0, 0, 1, 1], [], []>} : vector<8x128xbf16>, vector<128x128xbf16>, vector<8x128xf32> -> vector<8x128xf32>
    %c0_9 = arith.constant 0 : index
    %c0_10 = arith.constant 0 : index
    %12 = vector.load %arg5[%c0_9, %c0_10] : memref<1x128xf32, #tpu.memory_space<vmem>>, vector<1x128xf32>
    %13 = vector.broadcast %12 : vector<1x128xf32> to vector<8x128xf32>
    %14 = arith.addf %11, %13 : vector<8x128xf32>
    %cst_11 = arith.constant 0.000000e+00 : f32
    %15 = vector.broadcast %cst_11 : f32 to vector<8x128xf32>
    %16 = arith.maximumf %14, %15 : vector<8x128xf32>
    %17 = arith.truncf %16 : vector<8x128xf32> to vector<8x128xbf16>
    %c0_12 = arith.constant 0 : index
    %c0_13 = arith.constant 0 : index
    %18 = vector.load %arg6[%c0_12, %c0_13] : memref<128x128xbf16, #tpu.memory_space<vmem>>, vector<128x128xbf16>
    %cst_14 = arith.constant dense<0.000000e+00> : vector<8x128xf32>
    %19 = tpu.matmul %17, %18, %cst_14 {dimension_numbers = #tpu.dot_dimension_numbers<[1], [0], [0], [1], [0, 0, 1, 1], [], []>} : vector<8x128xbf16>, vector<128x128xbf16>, vector<8x128xf32> -> vector<8x128xf32>
    %c0_15 = arith.constant 0 : index
    %c0_16 = arith.constant 0 : index
    %20 = vector.load %arg7[%c0_15, %c0_16] : memref<1x128xf32, #tpu.memory_space<vmem>>, vector<1x128xf32>
    %21 = vector.broadcast %20 : vector<1x128xf32> to vector<8x128xf32>
    %22 = arith.addf %19, %21 : vector<8x128xf32>
    %23 = arith.truncf %22 : vector<8x128xf32> to vector<8x128xbf16>
    %c0_17 = arith.constant 0 : index
    %c0_18 = arith.constant 0 : index
    %24 = vector.load %arg8[%c0_17, %c0_18] : memref<8x128xbf16, #tpu.memory_space<vmem>>, vector<8x128xbf16>
    tpu.vector_store %arg8[%c0_17, %c0_18], %23 {strides = array<i32>} : memref<8x128xbf16, #tpu.memory_space<vmem>>, vector<8x128xbf16>,
    return
  }
  func.func @transform_0(%arg0: i32) -> (i32, i32) {
    %c0_i32 = arith.constant 0 : i32
    %c0_i32_0 = arith.constant 0 : i32
    return %arg0, %c0_i32 : i32, i32
  }
  func.func @transform_1(%arg0: i32) -> (i32, i32) {
    %c0_i32 = arith.constant 0 : i32
    %c0_i32_0 = arith.constant 0 : i32
    %c0_i32_1 = arith.constant 0 : i32
    return %c0_i32, %c0_i32_0 : i32, i32
  }
  func.func @transform_2(%arg0: i32) -> (i32, i32) {
    %c0_i32 = arith.constant 0 : i32
    %c0_i32_0 = arith.constant 0 : i32
    %c0_i32_1 = arith.constant 0 : i32
    return %c0_i32, %c0_i32_0 : i32, i32
  }
  func.func @transform_3(%arg0: i32) -> (i32, i32) {
    %c0_i32 = arith.constant 0 : i32
    %c0_i32_0 = arith.constant 0 : i32
    %c0_i32_1 = arith.constant 0 : i32
    return %c0_i32, %c0_i32_0 : i32, i32
  }
  func.func @transform_4(%arg0: i32) -> (i32, i32) {
    %c0_i32 = arith.constant 0 : i32
    %c0_i32_0 = arith.constant 0 : i32
    %c0_i32_1 = arith.constant 0 : i32
    return %c0_i32, %c0_i32_0 : i32, i32
  }
  func.func @transform_5(%arg0: i32) -> (i32, i32) {
    %c0_i32 = arith.constant 0 : i32
    %c0_i32_0 = arith.constant 0 : i32
    %c0_i32_1 = arith.constant 0 : i32
    return %c0_i32, %c0_i32_0 : i32, i32
  }
  func.func @transform_6(%arg0: i32) -> (i32, i32) {
    %c0_i32 = arith.constant 0 : i32
    %c0_i32_0 = arith.constant 0 : i32
    %c0_i32_1 = arith.constant 0 : i32
    return %c0_i32, %c0_i32_0 : i32, i32
  }
  func.func @transform_7(%arg0: i32) -> (i32, i32) {
    %c0_i32 = arith.constant 0 : i32
    %c0_i32_0 = arith.constant 0 : i32
    return %arg0, %c0_i32 : i32, i32
  }
}

</mosaic_0001>

<bundles_post_ra>
// kernel: tpu_custom_call.1
= control target key start
LH: loop header
LB: loop body
LE: loop exit
PB: predicated region body
PF: predicated region fallthrough
CT: control target
= control target key end

     0   :  { %12 = vsyncpa [#allocation3], 0  ;;  %s615_s0 = inlined_call_operand.hbm [shape: f32[8,32], index: 0, kind: input, shape index: {}]   ;;  %s616_s1 = inlined_call_operand.hbm [shape: bf16[32,128], index: 1, kind: input, shape index: {}]   ;;  %s617_s2 = inlined_call_operand.vmem [shape: f32[1,128], index: 2, kind: input, shape index: {}]   ;;  %s618_s3 = inlined_call_operand.hbm [shape: bf16[128,128], index: 3, kind: input, shape index: {}]   ;;  %s619_s4 = inlined_call_operand.vmem [shape: f32[1,128], index: 4, kind: input, shape index: {}]   ;;  %s620_s5 = inlined_call_operand.hbm [shape: bf16[128,128], index: 5, kind: input, shape index: {}]   ;;  %s621_s6 = inlined_call_operand.vmem [shape: f32[1,128], index: 6, kind: input, shape index: {}]   ;;  %s622_s7 = inlined_call_operand.hbm [shape: bf16[8,128], index: 7, kind: output, shape index: {}]  }
   0x1   :  { %13 = vsyncpa [#allocation6], 0 }
   0x2   :  { %14 = vsyncpa [#allocation9], 0  ;;  %s31_s26 = sshll.u32 %s616_s1, 4  ;;  %s32_s26 = int_to_ptr.hbm [resolvable:$true] %s31_s26 }
   0x3   :  { %15 = vsyncpa [#allocation4], 0  ;;  %s544_s27 = smov [#allocation5]   ;;  %s21_s8 = sshll.u32 %s615_s0, 4  ;;  %s22_s8 = int_to_ptr.hbm [resolvable:$true] %s21_s8 }
   0x4   :  { %s33_s28 = sshll.u32 %s544_s27, 4  ;;  %s545_s9 = smov 64   ;;  %s34_s28 = int_to_ptr.vmem [resolvable:$true] %s33_s28 }
   0x5   :  { %s546_s10 = smov 4   ;;  %s547_s11 = smov [#allocation2]  }
   0x6   :  { %39 = dma.hbm_to_vmem [thread:$0]  %s32_s26, 256, %s34_s28, [#allocation6], %s545_s9, %s545_s9, %s546_s10  }
   0x7   :  { %s23_s12 = sshll.u32 %s547_s11, 4  ;;  %s46_s15 = sshll.u32 %s618_s3, 4  ;;  %s24_s12 = int_to_ptr.vmem [resolvable:$true] %s23_s12  ;;  %s47_s15 = int_to_ptr.hbm [resolvable:$true] %s46_s15 }
   0x8   :  { %26 = dma.hbm_to_vmem [thread:$0]  %s22_s8, 128, %s24_s12, [#allocation3]  }
   0x9   :  { %s61_s17 = sshll.u32 %s620_s5, 4  ;;  %s548_s18 = smov [#allocation7]   ;;  %s62_s17 = int_to_ptr.hbm [resolvable:$true] %s61_s17 }
   0xa   :  { %s48_s19 = sshll.u32 %s548_s18, 4  ;;  %s549_s0 = smov [#allocation8]   ;;  %s49_s19 = int_to_ptr.vmem [resolvable:$true] %s48_s19 }
   0xb   :  { %54 = dma.hbm_to_vmem [thread:$0]  %s47_s15, 1024, %s49_s19, [#allocation6], %s545_s9, %s545_s9, %s546_s10  }
   0xc   :  { %s63_s20 = sshll.u32 %s549_s0, 4  ;;  %s64_s20 = int_to_ptr.vmem [resolvable:$true] %s63_s20 }
   0xd   :  { %69 = dma.hbm_to_vmem [thread:$0]  %s62_s17, 1024, %s64_s20, [#allocation9], %s545_s9, %s545_s9, %s546_s10  }
   0xe   :  { %536 = dma.done.wait [#allocation3], 128  }
   0xf   :  { %537 = vsyncadd [#allocation3], 4294967168 }
  0x10   :  { %538 = dma.done.wait [#allocation6], 1280  }
  0x11   :  { %539 = vsyncadd [#allocation6], 4294966016 }
  0x12   :  { %540 = dma.done.wait [#allocation9], 1024  }
  0x13   :  { %541 = vsyncadd [#allocation9], 4294966272  ;;  %v389_v0 = vld [vmem:[#allocation5 + $0x8] sm:$0xff]  ;;  %v388_v2 = vld [vmem:[#allocation5] sm:$0xff]  ;;  %vm111_vm0 = vcmask 261120   ;;  %s550_s24 = smov [#allocation10]  }
  0x14   :  { %v397_v1 = vld [vmem:[#allocation7 + $0x38] sm:$0xff]  ;;  %121 = vmatpush.bf16.msra.mxu0 %v389_v0  ;;  %v89_v3 = vld [vmem:[#allocation2] sm:$0xff]  ;;  %v396_v4 = vld [vmem:[#allocation7 + $0x30] sm:$0xff]  ;;  %s301_s25 = sshll.u32 %s550_s24, 4  ;;  %s303_s28 = sshll.u32 %s622_s7, 4  ;;  %s302_s25 = int_to_ptr.vmem [resolvable:$true] %s301_s25  ;;  %s304_s28 = int_to_ptr.hbm [resolvable:$true] %s303_s28 }
  0x15   :  { %198 = vmatpush.bf16.msra.mxu1 %v397_v1  ;;  %v90_v5 = vpack.c.bf16 %v89_v3, %v89_v3  ;;  %v395_v6 = vld [vmem:[#allocation7 + $0x28] sm:$0xff]  ;;  %v394_v7 = vld [vmem:[#allocation7 + $0x20] sm:$0xff]  ;;  %v393_v8 = vld [vmem:[#allocation7 + $0x18] sm:$0xff] }
  0x16   :  { %v392_v9 = vld [vmem:[#allocation7 + $0x10] sm:$0xff]  ;;  %v391_v10 = vld [vmem:[#allocation7 + $0x8] sm:$0xff]  ;;  %v390_v11 = vld [vmem:[#allocation7] sm:$0xff] }
  0x17   :  { %v405_v12 = vld [vmem:[#allocation8 + $0x38] sm:$0xff]  ;;  %v404_v13 = vld [vmem:[#allocation8 + $0x30] sm:$0xff]  ;;  %v403_v14 = vld [vmem:[#allocation8 + $0x28] sm:$0xff] }
  0x18   :  { %122 = vmatpush.bf16.msra.mxu0 %v388_v2  ;;  %281 = vmatpush.bf16.msra.mxu2 %v405_v12  ;;  %v402_v15 = vld [vmem:[#allocation8 + $0x20] sm:$0xff]  ;;  %v401_v16 = vld [vmem:[#allocation8 + $0x18] sm:$0xff]  ;;  %v400_v17 = vld [vmem:[#allocation8 + $0x10] sm:$0xff] }
  0x19   :  { %199 = vmatpush.bf16.msra.mxu1 %v396_v4  ;;  %v413_v18 = vld [vmem:[%s617_s2] ss:$0 sm:$0xff]  ;;  %v398_v25 = vld [vmem:[#allocation8] sm:$0xff] }
  0x1a   :  { %v399_v24 = vld [vmem:[#allocation8 + $0x8] sm:$0xff] }
  0x1b   :  { %323 = vmatmul.msk.bf16.vlgmr.msra.gmra.mxu0 %vm111_vm0, %v90_v5  ;;  %v414_v26 = vld [vmem:[%s619_s4] ss:$0 sm:$0xff] }
  0x1c   :  { %282 = vmatpush.bf16.msra.mxu2 %v404_v13  ;;  %v415_v32 = vld [vmem:[%s621_s6] ss:$0 sm:$0xff] }
  0x1d   :  { %200 = vmatpush.bf16.msra.mxu1 %v395_v6 }
  0x20   :  { %283 = vmatpush.bf16.msra.mxu2 %v403_v14 }
  0x21   :  { %201 = vmatpush.bf16.msra.mxu1 %v394_v7 }
  0x24   :  { %284 = vmatpush.bf16.msra.mxu2 %v402_v15 }
  0x25   :  { %202 = vmatpush.bf16.msra.mxu1 %v393_v8 }
  0x28   :  { %285 = vmatpush.bf16.msra.mxu2 %v401_v16 }
  0x29   :  { %203 = vmatpush.bf16.msra.mxu1 %v392_v9 }
  0x2c   :  { %286 = vmatpush.bf16.msra.mxu2 %v400_v17 }
  0x2d   :  { %204 = vmatpush.bf16.msra.mxu1 %v391_v10 }
  0x30   :  { %287 = vmatpush.bf16.msra.mxu2 %v399_v24 }
  0x31   :  { %205 = vmatpush.bf16.msra.mxu1 %v390_v11 }
  0x34   :  { %288 = vmatpush.bf16.msra.mxu2 %v398_v25 }
  0x98   :  { %v124_v19 = vpop.f32.mrf.mxu0 }
  0x99   :  { %v125_v20 = vadd.f32 %v413_v18, %v124_v19 }
  0x9b   :  { %v128_v21 = vmax.f32 %v125_v20, 0.0 }
  0x9d   :  { %v129_v22 = vpack.c.bf16 %v128_v21, %v128_v21 }
  0x9f   :  { %206 = vmatmul.bf16.vlgmr.msra.gmra.mxu1 %v129_v22 }
  0xa0   :  { %v126_v23 = vpop.f32.mrf.mxu0 }
 0x11c   :  { %v207_v27 = vpop.f32.mrf.mxu1 }
 0x11d   :  { %v208_v28 = vadd.f32 %v414_v26, %v207_v27 }
 0x11f   :  { %v211_v29 = vmax.f32 %v208_v28, 0.0 }
 0x121   :  { %v212_v30 = vpack.c.bf16 %v211_v29, %v211_v29 }
 0x123   :  { %289 = vmatmul.bf16.vlgmr.msra.gmra.mxu2 %v212_v30 }
 0x124   :  { %v209_v31 = vpop.f32.mrf.mxu1 }
 0x1a6   :  { %v290_v33 = vpop.f32.mrf.mxu2 }
 0x1a7   :  { %v291_v34 = vadd.f32 %v415_v32, %v290_v33 }
 0x1a9   :  { %v294_v35 = vpack.c.bf16 %v291_v34, %v291_v34 }
 0x1ab   :  { %295 = vst [vmem:[#allocation10] sm:$0xf] %v294_v35 }
 0x1ac   :  { %306 = dma.vmem_to_hbm [thread:$0]  %s302_s25, 64, %s304_s28, [#allocation4]  }
 0x1ae   :  { %v292_v36 = vpop.f32.mrf.mxu2 }
 0x1af   :  { %542 = dma.done.wait [#allocation4], 64  }
 0x1b0   :  { %543 = vsyncadd [#allocation4], 4294967232 }
 0x1b1   :  { %311 = vsyncpa [#allocation3], 1 }
 0x1b2   :  { %312 = vsyncpa [#allocation6], 1 }
 0x1b3   :  { %313 = vsyncpa [#allocation9], 1 }
 0x1b4   :  { %314 = vsyncpa [#allocation4], 1 }

</bundles_post_ra>
